<compile_context>
chip_gen: v5e
topology: v5e:2x2
jax: 0.10.0
libtpu: 0.0.40
codegen_flags: <defaults>
</compile_context>

<pallas_src>
import jax
import jax.numpy as jnp
from jax import lax
from jax.experimental import pallas as pl
from jax.experimental.pallas import tpu as pltpu


def norm_kernel(x_ref, gamma_ref, beta_ref, o_ref):
    """Row-wise normalization of a [TR, H] tile.

    x_ref:     [TR, H]  input rows (VMEM)
    gamma_ref: [1]      scalar scale (SMEM)
    beta_ref:  [1]      scalar shift (SMEM)
    o_ref:     [TR, H]  output rows (VMEM)
    """
    x = x_ref[...].astype(jnp.float32)                          # [TR, H]
    h = x.shape[-1]

    mu = jnp.mean(x, axis=-1, keepdims=True)                    # [TR, 1] (XLU reduce)
    d = x - mu
    # torch.var default is unbiased: divide by (H - 1).
    var = jnp.sum(d * d, axis=-1, keepdims=True) * (1.0 / (h - 1))
    inv = lax.rsqrt(var + 1e-8)                                 # EUP rsqrt (free slot)

    g = gamma_ref[0]
    b = beta_ref[0]
    o_ref[...] = (d * (g * inv) + b).astype(o_ref.dtype)        # lane-dense store


def _choose_block_rows(n, target=512):
    """Largest row tile <= target that divides n and is a multiple of 8
    (falls back to n itself for small/awkward n), so every block is full."""
    if n <= target:
        return n
    t = (target // 8) * 8
    while t >= 8:
        if n % t == 0:
            return t
        t -= 8
    return n


def norm(x, gamma, beta, *, block_rows=512):
    """x: [B, S, H]; gamma, beta: scalar parameters (as in the PyTorch module)."""
    B, S, H = x.shape
    N = B * S
    xr = x.reshape(N, H)                       # free reshape; rows are independent
    TR = _choose_block_rows(N, block_rows)
    grid = (N // TR,)

    g = jnp.asarray(gamma, jnp.float32).reshape(1)
    b = jnp.asarray(beta, jnp.float32).reshape(1)

    out = pl.pallas_call(
        norm_kernel,
        out_shape=jax.ShapeDtypeStruct((N, H), x.dtype),
        grid=grid,
        in_specs=[
            pl.BlockSpec((TR, H), lambda i: (i, 0)),
            pl.BlockSpec(memory_space=pltpu.MemorySpace.SMEM),
            pl.BlockSpec(memory_space=pltpu.MemorySpace.SMEM),
        ],
        out_specs=pl.BlockSpec((TR, H), lambda i: (i, 0)),
        compiler_params=pltpu.CompilerParams(
            dimension_semantics=("parallel",)),
    )(xr, g, b)
    return out.reshape(B, S, H)


if __name__ == "__main__":
    # Small shapes consistent with the module's forward: X is [B, S, H].
    B, S, H = 2, 8, 32

    key = jax.random.PRNGKey(0)
    x = jax.random.normal(key, (B, S, H), dtype=jnp.float32)

    # Module initializes gamma=1.0, beta=0.0; use non-trivial values so the
    # affine path is actually exercised (same formula / semantics).
    gamma = jnp.float32(1.25)
    beta = jnp.float32(-0.5)

    out = jax.block_until_ready(norm(x, gamma, beta))

    # Reference in plain JAX — exactly the PyTorch math (unbiased variance).
    mu = jnp.mean(x, axis=2, keepdims=True)
    var = jnp.var(x, axis=2, keepdims=True, ddof=1)
    ref = gamma * (x - mu) / jnp.sqrt(var + 1e-8) + beta

    assert out.shape == (B, S, H)
    assert jnp.allclose(out, ref, atol=1e-5, rtol=1e-5), "mismatch vs reference"

    print("KERNEL_OK")
</pallas_src>

<mosaic_0001>
module attributes {stable_mosaic.version = 11 : i64} {
  func.func @norm_kernel(%arg0: i32, %arg1: memref<16x32xf32, #tpu.memory_space<vmem>>, %arg2: memref<1xf32, #tpu.memory_space<smem>>, %arg3: memref<1xf32, #tpu.memory_space<smem>>, %arg4: memref<16x32xf32, #tpu.memory_space<vmem>>) attributes {dimension_semantics = [#tpu.dimension_semantics<parallel>], iteration_bounds = array<i64: 1>, scalar_prefetch = 0 : i64, scratch_operands = 0 : i64, tpu.core_type = #tpu.core_type<tc>, window_params = [{transform_indices = @transform_0, window_bounds = array<i64: 16, 32>}, {transform_indices = @transform_1, window_bounds = array<i64: 1>}, {transform_indices = @transform_2, window_bounds = array<i64: 1>}, {transform_indices = @transform_3, window_bounds = array<i64: 16, 32>}]} {
    %c0 = arith.constant 0 : index
    %c0_0 = arith.constant 0 : index
    %0 = vector.load %arg1[%c0, %c0_0] : memref<16x32xf32, #tpu.memory_space<vmem>>, vector<16x32xf32>
    %cst = arith.constant dense<0.000000e+00> : vector<16xf32>
    %1 = vector.multi_reduction <add>, %0, %cst [1] : vector<16x32xf32> to vector<16xf32>
    %2 = vector.shape_cast %1 : vector<16xf32> to vector<16x1xf32>
    %cst_1 = arith.constant 3.200000e+01 : f32
    %3 = vector.broadcast %cst_1 : f32 to vector<16x1xf32>
    %4 = arith.divf %2, %3 : vector<16x1xf32>
    %5 = vector.broadcast %4 : vector<16x1xf32> to vector<16x32xf32>
    %6 = arith.subf %0, %5 : vector<16x32xf32>
    %7 = arith.mulf %6, %6 : vector<16x32xf32>
    %cst_2 = arith.constant dense<0.000000e+00> : vector<16xf32>
    %8 = vector.multi_reduction <add>, %7, %cst_2 [1] : vector<16x32xf32> to vector<16xf32>
    %9 = vector.shape_cast %8 : vector<16xf32> to vector<16x1xf32>
    %cst_3 = arith.constant 0.0322580636 : f32
    %10 = vector.broadcast %cst_3 : f32 to vector<16x1xf32>
    %11 = arith.mulf %9, %10 : vector<16x1xf32>
    %cst_4 = arith.constant 9.99999993E-9 : f32
    %12 = vector.broadcast %cst_4 : f32 to vector<16x1xf32>
    %13 = arith.addf %11, %12 : vector<16x1xf32>
    %14 = math.rsqrt %13 : vector<16x1xf32>
    %c0_5 = arith.constant 0 : index
    %15 = memref.load %arg2[%c0_5] : memref<1xf32, #tpu.memory_space<smem>>
    %c0_6 = arith.constant 0 : index
    %16 = memref.load %arg3[%c0_6] : memref<1xf32, #tpu.memory_space<smem>>
    %17 = vector.broadcast %15 : f32 to vector<16x1xf32>
    %18 = arith.mulf %17, %14 : vector<16x1xf32>
    %19 = vector.broadcast %18 : vector<16x1xf32> to vector<16x32xf32>
    %20 = arith.mulf %6, %19 : vector<16x32xf32>
    %21 = vector.broadcast %16 : f32 to vector<16x32xf32>
    %22 = arith.addf %20, %21 : vector<16x32xf32>
    %c0_7 = arith.constant 0 : index
    %c0_8 = arith.constant 0 : index
    %23 = vector.load %arg4[%c0_7, %c0_8] : memref<16x32xf32, #tpu.memory_space<vmem>>, vector<16x32xf32>
    tpu.vector_store %arg4[%c0_7, %c0_8], %22 {strides = array<i32>} : memref<16x32xf32, #tpu.memory_space<vmem>>, vector<16x32xf32>,
    return
  }
  func.func @transform_0(%arg0: i32) -> (i32, i32) {
    %c0_i32 = arith.constant 0 : i32
    %c0_i32_0 = arith.constant 0 : i32
    return %arg0, %c0_i32 : i32, i32
  }
  func.func @transform_1(%arg0: i32) -> i32 {
    %c0_i32 = arith.constant 0 : i32
    %c0_i32_0 = arith.constant 0 : i32
    return %c0_i32 : i32
  }
  func.func @transform_2(%arg0: i32) -> i32 {
    %c0_i32 = arith.constant 0 : i32
    %c0_i32_0 = arith.constant 0 : i32
    return %c0_i32 : i32
  }
  func.func @transform_3(%arg0: i32) -> (i32, i32) {
    %c0_i32 = arith.constant 0 : i32
    %c0_i32_0 = arith.constant 0 : i32
    return %arg0, %c0_i32 : i32, i32
  }
}

</mosaic_0001>

<bundles_post_ra>
// kernel: tpu_custom_call.1
= control target key start
LH: loop header
LB: loop body
LE: loop exit
PB: predicated region body
PF: predicated region fallthrough
CT: control target
= control target key end

     0   :  { %10 = vsyncpa [#allocation5], 0  ;;  %s228_s0 = inlined_call_operand.hbm [shape: f32[16,32], index: 0, kind: input, shape index: {}]   ;;  %s229_s1 = inlined_call_operand.<no memory space> [shape: f32[1], index: 1, kind: input, shape index: {}]   ;;  %s230_s2 = inlined_call_operand.<no memory space> [shape: f32[1], index: 2, kind: input, shape index: {}]   ;;  %s231_s3 = inlined_call_operand.hbm [shape: f32[16,32], index: 3, kind: output, shape index: {}]  }
   0x1   :  { %11 = vsyncpa [#allocation6], 0  ;;  %s16_s14 = sshll.u32 %s228_s0, 4  ;;  %s179_s15 = smov [#allocation4]   ;;  %s17_s14 = int_to_ptr.hbm [resolvable:$true] %s16_s14 }
   0x2   :  { %s18_s16 = sshll.u32 %s179_s15, 4  ;;  %s180_s17 = smov 128   ;;  %s19_s16 = int_to_ptr.vmem [resolvable:$true] %s18_s16 }
   0x3   :  { %s181_s18 = smov 8  }
   0x4   :  { %24 = dma.hbm_to_vmem [thread:$0]  %s17_s14, 256, %s19_s16, [#allocation5], %s180_s17, %s180_s17, %s181_s18  }
   0x5   :  { %175 = dma.done.wait [#allocation5], 256  }
   0x6   :  { %176 = vsyncadd [#allocation5], 4294967040  ;;  %vm35_vm0 = vcmask 261120   ;;  %v33_v0 = vld [vmem:[#allocation4] sm:$0xff]  ;;  %v34_v2 = vld [vmem:[#allocation4 + $0x8] sm:$0xff]  ;;  %v182_v4 = vmov 32.0   ;;  %v87_v33 = vstv %s229_s1  ;;  %v92_v40 = vstv %s230_s2 }
   0x7   :  { %v36_v1 = vsel %vm35_vm0, %v33_v0, 0.0  ;;  %v39_v3 = vsel %vm35_vm0, %v34_v2, 0.0  ;;  %121 = vrcp.f32 %v182_v4  ;;  %s183_s1 = smov [#allocation7]   ;;  %s103_s25 = sshll.u32 %s231_s3, 4  ;;  %s104_s25 = int_to_ptr.hbm [resolvable:$true] %s103_s25 }
   0x8   :  { %37 = vadd.xlane.f32.xlu0 %v36_v1  ;;  %s101_s22 = sshll.u32 %s183_s1, 4  ;;  %s102_s22 = int_to_ptr.vmem [resolvable:$true] %s101_s22 }
   0xd   :  { %v122_v5 = vpop.eup %121 }
   0xe   :  { %v43_v6 = vmul.f32 32.0, %v122_v5  ;;  %vm47_vm1 = vweird.f32 %v122_v5 }
  0x10   :  { %40 = vadd.xlane.f32.xlu0 %v39_v3  ;;  %v44_v7 = vsub.f32 1.0, %v43_v6 }
  0x12   :  { %v45_v8 = vmul.f32 %v122_v5, %v44_v7 }
  0x14   :  { %v46_v9 = vadd.f32 %v122_v5, %v45_v8 }
  0x16   :  { %v48_v10 = vsel %vm47_vm1, %v122_v5, %v46_v9 }
  0x7b   :  { %v38_v11 = vpop.xlane.xlu0 %37 }
  0x7c   :  { %v49_v12 = vmul.f32 %v48_v10, %v38_v11 }
  0x7e   :  { %v51_v13 = vsub.f32 %v33_v0, %v49_v12 }
  0x80   :  { %v53_v14 = vmul.f32 %v51_v13, %v51_v13 }
  0x82   :  { %v55_v15 = vsel %vm35_vm0, %v53_v14, 0.0 }
  0x83   :  { %56 = vadd.xlane.f32.xlu1 %v55_v15  ;;  %v41_v16 = vpop.xlane.xlu0 %40 }
  0x84   :  { %v50_v17 = vmul.f32 %v48_v10, %v41_v16 }
  0x86   :  { %v52_v18 = vsub.f32 %v34_v2, %v50_v17 }
  0x88   :  { %v54_v19 = vmul.f32 %v52_v18, %v52_v18 }
  0x8a   :  { %v58_v20 = vsel %vm35_vm0, %v54_v19, 0.0 }
  0x8b   :  { %59 = vadd.xlane.f32.xlu1 %v58_v20 }
  0xf6   :  { %v57_v21 = vpop.xlane.xlu1 %56 }
  0xf7   :  { %v61_v22 = vmul.f32 0.032258064, %v57_v21 }
  0xf9   :  { %v63_v23 = vadd.f32 1e-08, %v61_v22 }
  0xfb   :  { %123 = vrsqrt.f32 %v63_v23  ;;  %vm71_vm3 = vweird.f32 %v63_v23 }
  0xfe   :  { %v60_v24 = vpop.xlane.xlu1 %59 }
  0xff   :  { %v62_v25 = vmul.f32 0.032258064, %v60_v24 }
 0x101   :  { %v124_v26 = vpop.eup %123  ;;  %v64_v27 = vadd.f32 1e-08, %v62_v25 }
 0x102   :  { %v66_v28 = vmul.f32 %v124_v26, %v63_v23  ;;  %vm72_vm2 = vweird.f32 %v124_v26 }
 0x103   :  { %125 = vrsqrt.f32 %v64_v27  ;;  %vm73_vm4 = vmor %vm71_vm3, %vm72_vm2  ;;  %vm81_vm6 = vweird.f32 %v64_v27 }
 0x104   :  { %v67_v29 = vmul.f32 %v124_v26, %v66_v28 }
 0x106   :  { %v68_v30 = vmul.f32 0.5, %v67_v29 }
 0x108   :  { %v69_v31 = vsub.f32 1.5, %v68_v30 }
 0x109   :  { %v126_v32 = vpop.eup %125 }
 0x10a   :  { %v70_v34 = vmul.f32 %v124_v26, %v69_v31  ;;  %v76_v35 = vmul.f32 %v126_v32, %v64_v27  ;;  %vm82_vm5 = vweird.f32 %v126_v32 }
 0x10b   :  { %vm83_vm7 = vmor %vm81_vm6, %vm82_vm5 }
 0x10c   :  { %v74_v36 = vsel %vm73_vm4, %v124_v26, %v70_v34  ;;  %v77_v37 = vmul.f32 %v126_v32, %v76_v35 }
 0x10d   :  { %v88_v38 = vmul.f32 %v87_v33, %v74_v36 }
 0x10e   :  { %v78_v39 = vmul.f32 0.5, %v77_v37 }
 0x10f   :  { %v90_v41 = vmul.f32 %v88_v38, %v51_v13 }
 0x110   :  { %v79_v42 = vsub.f32 1.5, %v78_v39 }
 0x111   :  { %v93_v43 = vadd.f32 %v92_v40, %v90_v41 }
 0x112   :  { %v80_v44 = vmul.f32 %v126_v32, %v79_v42 }
 0x113   :  { %95 = vst.msk [vmem:[#allocation7] sm:$0xff] %vm35_vm0, %v93_v43 }
 0x114   :  { %v84_v45 = vsel %vm83_vm7, %v126_v32, %v80_v44 }
 0x115   :  { %v89_v46 = vmul.f32 %v87_v33, %v84_v45 }
 0x117   :  { %v91_v47 = vmul.f32 %v89_v46, %v52_v18 }
 0x119   :  { %v94_v48 = vadd.f32 %v92_v40, %v91_v47 }
 0x11b   :  { %96 = vst.msk [vmem:[#allocation7 + $0x8] sm:$0xff] %vm35_vm0, %v94_v48 }
 0x11c   :  { %109 = dma.vmem_to_hbm [thread:$0]  %s102_s22, 256, %s104_s25, [#allocation6], %s180_s17, %s180_s17, %s181_s18  }
 0x11d   :  { %177 = dma.done.wait [#allocation6], 256  }
 0x11e   :  { %178 = vsyncadd [#allocation6], 4294967040 }
 0x11f   :  { %114 = vsyncpa [#allocation5], 1 }
 0x120   :  { %115 = vsyncpa [#allocation6], 1 }

</bundles_post_ra>
